<compile_context>
chip_gen: v6e
topology: v6e:2x2x1
jax: 0.10.0
libtpu: 0.0.40
codegen_flags: <defaults>
</compile_context>

<pallas_src>
import functools

import jax
import jax.numpy as jnp
import numpy as np
from jax.experimental import pallas as pl
from jax.experimental.pallas import tpu as pltpu

BN_EPS = 1e-5


def _round_up(x, m):
    return (x + m - 1) // m * m


# ----------------------------- Pallas kernels ------------------------------ #

def _matmul_kernel(x_ref, w_ref, o_ref, acc_ref):
    # grid = (M_tiles, N_tiles, K_tiles); K innermost / "arbitrary".
    @pl.when(pl.program_id(2) == 0)
    def _():
        acc_ref[...] = jnp.zeros_like(acc_ref)

    acc_ref[...] += jnp.dot(x_ref[...], w_ref[...],
                            preferred_element_type=jnp.float32)

    @pl.when(pl.program_id(2) == pl.num_programs(2) - 1)
    def _():
        o_ref[...] = acc_ref[...].astype(o_ref.dtype)


def _matmul_residual_kernel(x_ref, w_ref, r_ref, o_ref, acc_ref):
    # Same as above, but the residual tile is folded into the epilogue
    # (read once per output tile, added in f32).
    @pl.when(pl.program_id(2) == 0)
    def _():
        acc_ref[...] = jnp.zeros_like(acc_ref)

    acc_ref[...] += jnp.dot(x_ref[...], w_ref[...],
                            preferred_element_type=jnp.float32)

    @pl.when(pl.program_id(2) == pl.num_programs(2) - 1)
    def _():
        o_ref[...] = (acc_ref[...] +
                      r_ref[...].astype(jnp.float32)).astype(o_ref.dtype)


def _bn_stats_kernel(x_ref, sum_ref, sq_ref):
    # Per-channel sum / sum-of-squares, accumulated across the M grid axis.
    @pl.when(pl.program_id(0) == 0)
    def _():
        sum_ref[...] = jnp.zeros_like(sum_ref)
        sq_ref[...] = jnp.zeros_like(sq_ref)

    x = x_ref[...].astype(jnp.float32)
    sum_ref[...] += jnp.sum(x, axis=0, keepdims=True)
    sq_ref[...] += jnp.sum(x * x, axis=0, keepdims=True)


def _bn_apply_kernel(x_ref, sum_ref, sq_ref, gamma_ref, beta_ref, o_ref, *,
                     inv_count):
    # Training-mode BN (biased variance) + ReLU, applied per M tile.
    x = x_ref[...].astype(jnp.float32)
    mean = sum_ref[...] * inv_count
    var = sq_ref[...] * inv_count - mean * mean
    rstd = jax.lax.rsqrt(var + BN_EPS)                    # EUP, not div/sqrt
    y = (x - mean) * (rstd * gamma_ref[...]) + beta_ref[...]
    o_ref[...] = jnp.maximum(y, 0.0).astype(o_ref.dtype)


# ------------------------------ Kernel wrappers ----------------------------- #

def pallas_matmul(x, w, residual=None, out_dtype=jnp.float32,
                  tm=512, tn=256, tk=1152):
    """Tiled (M,K)x(K,N) matmul; bf16 inputs, f32 accumulation.

    If `residual` is given it is added to the result in the epilogue.
    """
    M, K = x.shape
    K2, N = w.shape
    assert K == K2

    tm = min(tm, _round_up(M, 8))
    tn = min(tn, _round_up(N, 128))
    tk = min(tk, _round_up(K, 128))
    Mp, Kp, Np = _round_up(M, tm), _round_up(K, tk), _round_up(N, tn)

    xp = jnp.pad(x.astype(jnp.bfloat16), ((0, Mp - M), (0, Kp - K)))
    wp = jnp.pad(w.astype(jnp.bfloat16), ((0, Kp - K), (0, Np - N)))

    in_specs = [
        pl.BlockSpec((tm, tk), lambda i, j, k: (i, k)),
        pl.BlockSpec((tk, tn), lambda i, j, k: (k, j)),
    ]
    args = [xp, wp]
    if residual is not None:
        rp = jnp.pad(residual.astype(jnp.float32), ((0, Mp - M), (0, Np - N)))
        in_specs.append(pl.BlockSpec((tm, tn), lambda i, j, k: (i, j)))
        args.append(rp)
        kernel = _matmul_residual_kernel
    else:
        kernel = _matmul_kernel

    out = pl.pallas_call(
        kernel,
        out_shape=jax.ShapeDtypeStruct((Mp, Np), out_dtype),
        grid=(Mp // tm, Np // tn, Kp // tk),
        in_specs=in_specs,
        out_specs=pl.BlockSpec((tm, tn), lambda i, j, k: (i, j)),
        scratch_shapes=[pltpu.VMEM((tm, tn), jnp.float32)],
        compiler_params=pltpu.CompilerParams(
            dimension_semantics=("parallel", "parallel", "arbitrary")),
    )(*args)
    return out[:M, :N]


def bn_relu(x2d, gamma_row, beta_row, out_dtype=jnp.bfloat16, tm=1024):
    """Training-mode BatchNorm (batch stats over rows) + ReLU, tiled over M.

    x2d: (M, C) with C a multiple of 128 (padded channels are zero).
    Returns (M, C) in `out_dtype`.
    """
    M, C = x2d.shape
    tm = min(tm, _round_up(M, 8))
    Mp = _round_up(M, tm)
    xp = jnp.pad(x2d, ((0, Mp - M), (0, 0)))   # zero rows don't change sums
    grid = (Mp // tm,)

    sums, sqs = pl.pallas_call(
        _bn_stats_kernel,
        out_shape=(jax.ShapeDtypeStruct((1, C), jnp.float32),
                   jax.ShapeDtypeStruct((1, C), jnp.float32)),
        grid=grid,
        in_specs=[pl.BlockSpec((tm, C), lambda i: (i, 0))],
        out_specs=(pl.BlockSpec((1, C), lambda i: (0, 0)),
                   pl.BlockSpec((1, C), lambda i: (0, 0))),
        compiler_params=pltpu.CompilerParams(
            dimension_semantics=("arbitrary",)),
    )(xp)

    apply_kernel = functools.partial(_bn_apply_kernel, inv_count=1.0 / M)
    y = pl.pallas_call(
        apply_kernel,
        out_shape=jax.ShapeDtypeStruct((Mp, C), out_dtype),
        grid=grid,
        in_specs=[pl.BlockSpec((tm, C), lambda i: (i, 0)),
                  pl.BlockSpec((1, C), lambda i: (0, 0)),
                  pl.BlockSpec((1, C), lambda i: (0, 0)),
                  pl.BlockSpec((1, C), lambda i: (0, 0)),
                  pl.BlockSpec((1, C), lambda i: (0, 0))],
        out_specs=pl.BlockSpec((tm, C), lambda i: (i, 0)),
        compiler_params=pltpu.CompilerParams(
            dimension_semantics=("parallel",)),
    )(xp, sums, sqs, gamma_row, beta_row)
    return y[:M]


# ------------------------------ PreActBlock -------------------------------- #

def _im2col_3x3(a_nhwc, stride, ho, wo):
    """Pad by 1 and fold the nine 3x3 taps into the channel (K) axis."""
    n, _, _, c = a_nhwc.shape
    ap = jnp.pad(a_nhwc, ((0, 0), (1, 1), (1, 1), (0, 0)))
    cols = [
        ap[:, dy:dy + stride * (ho - 1) + 1:stride,
           dx:dx + stride * (wo - 1) + 1:stride, :]
        for dy in range(3) for dx in range(3)
    ]
    # TODO(synk): option (b) of the review — generate the 9 shifts via
    # BlockSpec index_map over the padded activation (no 9x HBM slab).
    return jnp.concatenate(cols, axis=-1).reshape(n * ho * wo, 9 * c)


def preact_block_prepare(params):
    """One-time parameter prep: transpose/reshape/pad weights, pad BN params."""
    g1, b1, w1, g2, b2, w2, ws = params
    P, Cin = w1.shape[0], w1.shape[1]
    Cp = _round_up(Cin, 128)
    Pp = _round_up(P, 128)

    def pad_vec(v, n):
        return jnp.pad(v.astype(jnp.float32), (0, n - v.shape[0])).reshape(1, n)

    def conv3x3_weight(w, cin, cinp, cout, coutp):
        # OIHW -> (3,3,Cin,P), pad channels, flatten to (9*Cinp, Pp), bf16.
        w = jnp.transpose(w.astype(jnp.float32), (2, 3, 1, 0))
        w = jnp.pad(w, ((0, 0), (0, 0), (0, cinp - cin), (0, coutp - cout)))
        return w.reshape(9 * cinp, coutp).astype(jnp.bfloat16)

    prep = {
        "Cin": Cin, "P": P, "Cp": Cp, "Pp": Pp,
        "g1": pad_vec(g1, Cp), "b1": pad_vec(b1, Cp),
        "g2": pad_vec(g2, Pp), "b2": pad_vec(b2, Pp),
        "w1": conv3x3_weight(w1, Cin, Cp, P, Pp),
        "w2": conv3x3_weight(w2, P, Pp, P, Pp),
    }
    if ws is not None:
        wsr = jnp.transpose(ws.astype(jnp.float32), (2, 3, 1, 0)).reshape(Cin, P)
        prep["ws"] = jnp.pad(wsr, ((0, Cp - Cin), (0, Pp - P))).astype(jnp.bfloat16)
    else:
        prep["ws"] = None
    return prep


def preact_block_forward(x_nchw, prep, stride):
    """Forward pass matching PreActBlock.forward (training-mode BN)."""
    N, Cin, H, W = x_nchw.shape
    assert Cin == prep["Cin"]
    Cp, Pp, P = prep["Cp"], prep["Pp"], prep["P"]
    s = stride
    Ho = (H - 1) // s + 1
    Wo = (W - 1) // s + 1
    M = N * Ho * Wo

    # NCHW -> NHWC with channels padded to a multiple of 128 lanes.
    x = jnp.transpose(x_nchw, (0, 2, 3, 1)).astype(jnp.float32)
    x = jnp.pad(x, ((0, 0), (0, 0), (0, 0), (0, Cp - Cin)))

    # a = relu(bn1(x))  (bf16, channels-last)
    a = bn_relu(x.reshape(N * H * W, Cp), prep["g1"], prep["b1"])
    a = a.reshape(N, H, W, Cp)

    # shortcut = 1x1 conv of a (strided) if present, else pre-BN x.
    if prep["ws"] is not None:
        a_s = a[:, ::s, ::s, :].reshape(M, Cp)
        sc = pallas_matmul(a_s, prep["ws"])                 # (M, Pp) f32
    else:
        sc = x.reshape(M, Cp)                               # Cp == Pp here

    # conv1: 3x3, stride s, pad 1  (single K-folded matmul, K = 9*Cp)
    slab1 = _im2col_3x3(a, s, Ho, Wo)                       # (M, 9*Cp) bf16
    c1 = pallas_matmul(slab1, prep["w1"])                   # (M, Pp) f32

    # relu(bn2(conv1))
    b = bn_relu(c1, prep["g2"], prep["b2"]).reshape(N, Ho, Wo, Pp)

    # conv2: 3x3, stride 1, pad 1, shortcut fused into the epilogue.
    slab2 = _im2col_3x3(b, 1, Ho, Wo)                       # (M, 9*Pp) bf16
    out = pallas_matmul(slab2, prep["w2"], residual=sc)     # (M, Pp) f32

    out = out[:, :P].reshape(N, Ho, Wo, P)
    return jnp.transpose(out, (0, 3, 1, 2))


# ------------------------------ pure-JAX reference -------------------------- #

def reference_forward(x, params, stride):
    g1, b1, w1, g2, b2, w2, ws = params

    def bn(z, g, b):
        mean = jnp.mean(z, axis=(0, 2, 3), keepdims=True)
        var = jnp.mean(jnp.square(z - mean), axis=(0, 2, 3), keepdims=True)
        return ((z - mean) / jnp.sqrt(var + BN_EPS)
                * g.reshape(1, -1, 1, 1) + b.reshape(1, -1, 1, 1))

    dn = ("NCHW", "OIHW", "NCHW")
    out = jax.nn.relu(bn(x, g1, b1))
    if ws is not None:
        sc = jax.lax.conv_general_dilated(out, ws, (stride, stride), "VALID",
                                          dimension_numbers=dn)
    else:
        sc = x
    out = jax.lax.conv_general_dilated(out, w1, (stride, stride),
                                       ((1, 1), (1, 1)), dimension_numbers=dn)
    out = jax.nn.relu(bn(out, g2, b2))
    out = jax.lax.conv_general_dilated(out, w2, (1, 1),
                                       ((1, 1), (1, 1)), dimension_numbers=dn)
    return out + sc


# ----------------------------------- main ----------------------------------- #

def _init_params(key, in_planes, planes, has_shortcut):
    ks = jax.random.split(key, 7)
    g1 = 1.0 + 0.1 * jax.random.normal(ks[0], (in_planes,), jnp.float32)
    b1 = 0.1 * jax.random.normal(ks[1], (in_planes,), jnp.float32)
    w1 = 0.2 * jax.random.normal(ks[2], (planes, in_planes, 3, 3), jnp.float32)
    g2 = 1.0 + 0.1 * jax.random.normal(ks[3], (planes,), jnp.float32)
    b2 = 0.1 * jax.random.normal(ks[4], (planes,), jnp.float32)
    w2 = 0.2 * jax.random.normal(ks[5], (planes, planes, 3, 3), jnp.float32)
    ws = (0.2 * jax.random.normal(ks[6], (planes, in_planes, 1, 1), jnp.float32)
          if has_shortcut else None)
    return (g1, b1, w1, g2, b2, w2, ws)


if __name__ == "__main__":
    key = jax.random.PRNGKey(0)
    k_x, k_p1, k_p2 = jax.random.split(key, 3)

    # bf16 matmul inputs (f32 accumulation) -> compare with loose-ish tol.
    RTOL = ATOL = 5e-2

    # Case 1: stride=2, in_planes != planes -> 1x1 conv shortcut branch.
    x = jax.random.normal(k_x, (2, 4, 16, 16), jnp.float32)
    params1 = _init_params(k_p1, in_planes=4, planes=8, has_shortcut=True)
    prep1 = preact_block_prepare(params1)            # one-time weight prep
    out1 = jax.block_until_ready(preact_block_forward(x, prep1, stride=2))
    ref1 = reference_forward(x, params1, stride=2)
    assert out1.shape == (2, 8, 8, 8)
    np.testing.assert_allclose(np.asarray(out1), np.asarray(ref1),
                               rtol=RTOL, atol=ATOL)

    # Case 2: stride=1, in_planes == planes -> identity shortcut branch.
    params2 = _init_params(k_p2, in_planes=4, planes=4, has_shortcut=False)
    prep2 = preact_block_prepare(params2)
    out2 = jax.block_until_ready(preact_block_forward(x, prep2, stride=1))
    ref2 = reference_forward(x, params2, stride=1)
    assert out2.shape == (2, 4, 16, 16)
    np.testing.assert_allclose(np.asarray(out2), np.asarray(ref2),
                               rtol=RTOL, atol=ATOL)

    print("KERNEL_OK")
</pallas_src>

<mosaic_0001>
module attributes {stable_mosaic.version = 11 : i64} {
  func.func @_bn_stats_kernel(%arg0: i32, %arg1: memref<512x128xf32, #tpu.memory_space<vmem>>, %arg2: memref<1x128xf32, #tpu.memory_space<vmem>>, %arg3: memref<1x128xf32, #tpu.memory_space<vmem>>) attributes {dimension_semantics = [#tpu.dimension_semantics<arbitrary>], iteration_bounds = array<i64: 1>, scalar_prefetch = 0 : i64, scratch_operands = 0 : i64, tpu.core_type = #tpu.core_type<tc>, window_params = [{transform_indices = @transform_0, window_bounds = array<i64: 512, 128>}, {pipeline_mode = #tpu.pipeline_mode<synchronous>, transform_indices = @transform_1, window_bounds = array<i64: 1, 128>}, {pipeline_mode = #tpu.pipeline_mode<synchronous>, transform_indices = @transform_2, window_bounds = array<i64: 1, 128>}]} {
    %c0_i32 = arith.constant 0 : i32
    %0 = arith.cmpi eq, %arg0, %c0_i32 : i32
    %1 = arith.extui %0 : i1 to i32
    %c0_i32_0 = arith.constant 0 : i32
    %2 = arith.cmpi ne, %1, %c0_i32_0 : i32
    scf.if %2 {
      %cst_11 = arith.constant 0.000000e+00 : f32
      %15 = vector.broadcast %cst_11 : f32 to vector<1x128xf32>
      %c0_12 = arith.constant 0 : index
      %c0_13 = arith.constant 0 : index
      %16 = vector.load %arg2[%c0_12, %c0_13] : memref<1x128xf32, #tpu.memory_space<vmem>>, vector<1x128xf32>
      tpu.vector_store %arg2[%c0_12, %c0_13], %15 {strides = array<i32>} : memref<1x128xf32, #tpu.memory_space<vmem>>, vector<1x128xf32>,
      %cst_14 = arith.constant 0.000000e+00 : f32
      %17 = vector.broadcast %cst_14 : f32 to vector<1x128xf32>
      %c0_15 = arith.constant 0 : index
      %c0_16 = arith.constant 0 : index
      %18 = vector.load %arg3[%c0_15, %c0_16] : memref<1x128xf32, #tpu.memory_space<vmem>>, vector<1x128xf32>
      tpu.vector_store %arg3[%c0_15, %c0_16], %17 {strides = array<i32>} : memref<1x128xf32, #tpu.memory_space<vmem>>, vector<1x128xf32>,
    } else {
    }
    %c0 = arith.constant 0 : index
    %c0_1 = arith.constant 0 : index
    %3 = vector.load %arg1[%c0, %c0_1] : memref<512x128xf32, #tpu.memory_space<vmem>>, vector<512x128xf32>
    %c0_2 = arith.constant 0 : index
    %c0_3 = arith.constant 0 : index
    %4 = vector.load %arg2[%c0_2, %c0_3] : memref<1x128xf32, #tpu.memory_space<vmem>>, vector<1x128xf32>
    %cst = arith.constant dense<0.000000e+00> : vector<128xf32>
    %5 = vector.multi_reduction <add>, %3, %cst [0] : vector<512x128xf32> to vector<128xf32>
    %6 = vector.shape_cast %5 : vector<128xf32> to vector<1x128xf32>
    %7 = arith.addf %4, %6 : vector<1x128xf32>
    %c0_4 = arith.constant 0 : index
    %c0_5 = arith.constant 0 : index
    %8 = vector.load %arg2[%c0_4, %c0_5] : memref<1x128xf32, #tpu.memory_space<vmem>>, vector<1x128xf32>
    tpu.vector_store %arg2[%c0_4, %c0_5], %7 {strides = array<i32>} : memref<1x128xf32, #tpu.memory_space<vmem>>, vector<1x128xf32>,
    %c0_6 = arith.constant 0 : index
    %c0_7 = arith.constant 0 : index
    %9 = vector.load %arg3[%c0_6, %c0_7] : memref<1x128xf32, #tpu.memory_space<vmem>>, vector<1x128xf32>
    %10 = arith.mulf %3, %3 : vector<512x128xf32>
    %cst_8 = arith.constant dense<0.000000e+00> : vector<128xf32>
    %11 = vector.multi_reduction <add>, %10, %cst_8 [0] : vector<512x128xf32> to vector<128xf32>
    %12 = vector.shape_cast %11 : vector<128xf32> to vector<1x128xf32>
    %13 = arith.addf %9, %12 : vector<1x128xf32>
    %c0_9 = arith.constant 0 : index
    %c0_10 = arith.constant 0 : index
    %14 = vector.load %arg3[%c0_9, %c0_10] : memref<1x128xf32, #tpu.memory_space<vmem>>, vector<1x128xf32>
    tpu.vector_store %arg3[%c0_9, %c0_10], %13 {strides = array<i32>} : memref<1x128xf32, #tpu.memory_space<vmem>>, vector<1x128xf32>,
    return
  }
  func.func @transform_0(%arg0: i32) -> (i32, i32) {
    %c0_i32 = arith.constant 0 : i32
    %c0_i32_0 = arith.constant 0 : i32
    return %arg0, %c0_i32 : i32, i32
  }
  func.func @transform_1(%arg0: i32) -> (i32, i32) {
    %c0_i32 = arith.constant 0 : i32
    %c0_i32_0 = arith.constant 0 : i32
    %c0_i32_1 = arith.constant 0 : i32
    return %c0_i32, %c0_i32_0 : i32, i32
  }
  func.func @transform_2(%arg0: i32) -> (i32, i32) {
    %c0_i32 = arith.constant 0 : i32
    %c0_i32_0 = arith.constant 0 : i32
    %c0_i32_1 = arith.constant 0 : i32
    return %c0_i32, %c0_i32_0 : i32, i32
  }
}

</mosaic_0001>

<bundles_post_ra>
// kernel: tpu_custom_call.1
= control target key start
LH: loop header
LB: loop body
LE: loop exit
PB: predicated region body
PF: predicated region fallthrough
CT: control target
= control target key end

     0   :  { %8 = vsyncpa [#allocation3], 0  ;;  %s435_s0 = inlined_call_operand.hbm [shape: f32[512,128], index: 0, kind: input, shape index: {}]   ;;  %s436_s1 = inlined_call_operand.hbm [shape: f32[1,128], index: 1, kind: output, shape index: {0}]   ;;  %s437_s2 = inlined_call_operand.hbm [shape: f32[1,128], index: 2, kind: output, shape index: {1}]  }
   0x1   :  { %9 = vsyncpa [#allocation4], 0 }
   0x2   :  { %10 = vsyncpa [#allocation7], 0  ;;  %s405_s9 = smov [#allocation2]  }
   0x3   :  { %s16_s10 = sshll.u32 %s405_s9, 4  ;;  %s17_s10 = int_to_ptr.vmem [resolvable:$true] %s16_s10 }
   0x4   :  { %s347_s11 = scalar_lea.vmem %s17_s10, 8192  ;;  %p352_p1 = scmp.lt.s32.totalorder %s17_s10, %s17_s10 }
   0x5   :  { %p348_p0 = scmp.ne.s32.totalorder %s17_s10, %s347_s11  ;;  %p353_p2 = scmp.lt.s32.totalorder %s347_s11, %s347_s11 }
   0x7   :  { %p354_p3 = por %p353_p2, %p352_p1 }
   0x9   :  { %p355_p4 = pnand %p354_p3, %p348_p0 }
   0xb   :  { %358 = shalt.err (!%p355_p4)
}
   0xc   :  { %s406_s12 = smov 128   ;;  %s407_s13 = smov 8  }
   0xd   :  { %22 = dma.hbm_to_vmem [thread:$0]  %s435_s0, 8192, %s17_s10, [#allocation3], %s406_s12, %s406_s12, %s407_s13  }
   0xe   :  { %399 = dma.done.wait [#allocation3], 8192  }
   0xf   :  { %400 = vsyncadd [#allocation3], 4294959104  ;;  %v408_v0 = vmov 0.0   ;;  %v32_v1 = vld [vmem:[#allocation2] sm:$0xff]  ;;  %v33_v2 = vld [vmem:[#allocation2 + $0x8] sm:$0xff]  ;;  %s409_s0 = smov [#allocation5]  }
  0x10   :  { %30 = vst [vmem:[#allocation5] sm:$0x1] %v408_v0  ;;  %31 = vst [vmem:[#allocation6] sm:$0x1] %v408_v0  ;;  %v34_v3 = vld [vmem:[#allocation2 + $0x10] sm:$0xff]  ;;  %v35_v4 = vld [vmem:[#allocation2 + $0x18] sm:$0xff]  ;;  %v97_v5 = vadd.f32 %v33_v2, %v32_v1  ;;  %v169_v6 = vmul.f32 %v32_v1, %v32_v1  ;;  %v170_v7 = vmul.f32 %v33_v2, %v33_v2 }
  0x11   :  { %v171_v8 = vmul.f32 %v34_v3, %v34_v3  ;;  %v36_v9 = vld [vmem:[#allocation2 + $0x20] sm:$0xff]  ;;  %v172_v11 = vmul.f32 %v35_v4, %v35_v4  ;;  %v37_v13 = vld [vmem:[#allocation2 + $0x28] sm:$0xff]  ;;  %v38_v17 = vld [vmem:[#allocation2 + $0x30] sm:$0xff]  ;;  %s310_s16 = sshll.u32 %s409_s0, 4  ;;  %s410_s17 = smov [#allocation6]   ;;  %s311_s16 = int_to_ptr.vmem [resolvable:$true] %s310_s16 }
  0x12   :  { %v98_v10 = vadd.f32 %v97_v5, %v34_v3  ;;  %v233_v12 = vadd.f32 %v170_v7, %v169_v6  ;;  %v173_v15 = vmul.f32 %v36_v9, %v36_v9  ;;  %v174_v19 = vmul.f32 %v37_v13, %v37_v13  ;;  %v39_v21 = vld [vmem:[#allocation2 + $0x38] sm:$0xff]  ;;  %v40_v25 = vld [vmem:[#allocation2 + $0x40] sm:$0xff]  ;;  %v41_v29 = vld [vmem:[#allocation2 + $0x48] sm:$0xff]  ;;  %s320_s18 = sshll.u32 %s410_s17, 4  ;;  %s359_s19 = scalar_lea.vmem %s311_s16, 16  ;;  %s321_s18 = int_to_ptr.vmem [resolvable:$true] %s320_s18 }
  0x13   :  { %v175_v23 = vmul.f32 %v38_v17, %v38_v17  ;;  %v176_v27 = vmul.f32 %v39_v21, %v39_v21  ;;  %v177_v31 = vmul.f32 %v40_v25, %v40_v25  ;;  %v42_v33 = vld [vmem:[#allocation2 + $0x50] sm:$0xff]  ;;  %v178_v35 = vmul.f32 %v41_v29, %v41_v29  ;;  %v43_v37 = vld [vmem:[#allocation2 + $0x58] sm:$0xff]  ;;  %v44_v41 = vld [vmem:[#allocation2 + $0x60] sm:$0xff]  ;;  %p360_p5 = scmp.ne.s32.totalorder %s311_s16, %s359_s19  ;;  %s363_s20 = scalar_lea.vmem %s311_s16, 32 }
  0x14   :  { %v99_v14 = vadd.f32 %v98_v10, %v35_v4  ;;  %v234_v16 = vadd.f32 %v233_v12, %v171_v8  ;;  %v179_v39 = vmul.f32 %v42_v33, %v42_v33  ;;  %v180_v43 = vmul.f32 %v43_v37, %v43_v37  ;;  %v45_v45 = vld [vmem:[#allocation2 + $0x68] sm:$0xff]  ;;  %v46_v49 = vld [vmem:[#allocation2 + $0x70] sm:$0xff]  ;;  %v47_v53 = vld [vmem:[#allocation2 + $0x78] sm:$0xff]  ;;  %p364_p6 = scmp.lt.s32.totalorder %s311_s16, %s311_s16  ;;  %p365_p7 = scmp.lt.s32.totalorder %s363_s20, %s359_s19 }
  0x15   :  { %v181_v47 = vmul.f32 %v44_v41, %v44_v41  ;;  %v182_v51 = vmul.f32 %v45_v45, %v45_v45  ;;  %v183_v55 = vmul.f32 %v46_v49, %v46_v49  ;;  %v48_v57 = vld [vmem:[#allocation2 + $0x80] sm:$0xff]  ;;  %v184_v59 = vmul.f32 %v47_v53, %v47_v53  ;;  %v49_v61 = vld [vmem:[#allocation2 + $0x88] sm:$0xff]  ;;  %v50_v1 = vld [vmem:[#allocation2 + $0x90] sm:$0xff] }
  0x16   :  { %v100_v18 = vadd.f32 %v99_v14, %v36_v9  ;;  %v235_v20 = vadd.f32 %v234_v16, %v172_v11  ;;  %v185_v63 = vmul.f32 %v48_v57, %v48_v57  ;;  %v186_v3 = vmul.f32 %v49_v61, %v49_v61  ;;  %v51_v5 = vld [vmem:[#allocation2 + $0x98] sm:$0xff]  ;;  %v52_v9 = vld [vmem:[#allocation2 + $0xa0] sm:$0xff]  ;;  %p366_p8 = por %p365_p7, %p364_p6 }
  0x17   :  { %v187_v7 = vmul.f32 %v50_v1, %v50_v1  ;;  %v188_v11 = vmul.f32 %v51_v5, %v51_v5 }
  0x18   :  { %v101_v22 = vadd.f32 %v100_v18, %v37_v13  ;;  %v236_v24 = vadd.f32 %v235_v20, %v173_v15  ;;  %v53_v13 = vld [vmem:[#allocation2 + $0xa8] sm:$0xff]  ;;  %v189_v15 = vmul.f32 %v52_v9, %v52_v9  ;;  %p367_p9 = pnand %p366_p8, %p360_p5 }
  0x1a   :  { %v102_v26 = vadd.f32 %v101_v22, %v38_v17  ;;  %v237_v28 = vadd.f32 %v236_v24, %v174_v19  ;;  %v54_v17 = vld [vmem:[#allocation2 + $0xb0] sm:$0xff]  ;;  %v190_v19 = vmul.f32 %v53_v13, %v53_v13 }
  0x1c   :  { %v103_v30 = vadd.f32 %v102_v26, %v39_v21  ;;  %v238_v32 = vadd.f32 %v237_v28, %v175_v23  ;;  %v55_v21 = vld [vmem:[#allocation2 + $0xb8] sm:$0xff]  ;;  %v191_v23 = vmul.f32 %v54_v17, %v54_v17 }
  0x1e   :  { %v104_v34 = vadd.f32 %v103_v30, %v40_v25  ;;  %v239_v36 = vadd.f32 %v238_v32, %v176_v27  ;;  %v56_v25 = vld [vmem:[#allocation2 + $0xc0] sm:$0xff]  ;;  %v192_v27 = vmul.f32 %v55_v21, %v55_v21 }
  0x20   :  { %v105_v38 = vadd.f32 %v104_v34, %v41_v29  ;;  %v240_v40 = vadd.f32 %v239_v36, %v177_v31  ;;  %v57_v29 = vld [vmem:[#allocation2 + $0xc8] sm:$0xff]  ;;  %v193_v31 = vmul.f32 %v56_v25, %v56_v25 }
  0x22   :  { %v106_v42 = vadd.f32 %v105_v38, %v42_v33  ;;  %v241_v44 = vadd.f32 %v240_v40, %v178_v35  ;;  %v58_v33 = vld [vmem:[#allocation2 + $0xd0] sm:$0xff]  ;;  %v194_v35 = vmul.f32 %v57_v29, %v57_v29 }
  0x24   :  { %v107_v46 = vadd.f32 %v106_v42, %v43_v37  ;;  %v242_v48 = vadd.f32 %v241_v44, %v179_v39  ;;  %v59_v37 = vld [vmem:[#allocation2 + $0xd8] sm:$0xff]  ;;  %v195_v39 = vmul.f32 %v58_v33, %v58_v33 }
  0x26   :  { %v108_v50 = vadd.f32 %v107_v46, %v44_v41  ;;  %v243_v52 = vadd.f32 %v242_v48, %v180_v43  ;;  %v60_v41 = vld [vmem:[#allocation2 + $0xe0] sm:$0xff]  ;;  %v196_v43 = vmul.f32 %v59_v37, %v59_v37 }
  0x28   :  { %v109_v54 = vadd.f32 %v108_v50, %v45_v45  ;;  %v244_v56 = vadd.f32 %v243_v52, %v181_v47  ;;  %v61_v45 = vld [vmem:[#allocation2 + $0xe8] sm:$0xff]  ;;  %v197_v47 = vmul.f32 %v60_v41, %v60_v41 }
  0x2a   :  { %v110_v58 = vadd.f32 %v109_v54, %v46_v49  ;;  %v245_v60 = vadd.f32 %v244_v56, %v182_v51  ;;  %v62_v49 = vld [vmem:[#allocation2 + $0xf0] sm:$0xff]  ;;  %v198_v51 = vmul.f32 %v61_v45, %v61_v45 }
  0x2c   :  { %v111_v62 = vadd.f32 %v110_v58, %v47_v53  ;;  %v246_v0 = vadd.f32 %v245_v60, %v183_v55  ;;  %v63_v53 = vld [vmem:[#allocation2 + $0xf8] sm:$0xff]  ;;  %v199_v55 = vmul.f32 %v62_v49, %v62_v49 }
  0x2e   :  { %v112_v2 = vadd.f32 %v111_v62, %v48_v57  ;;  %v247_v4 = vadd.f32 %v246_v0, %v184_v59  ;;  %v64_v57 = vld [vmem:[#allocation2 + $0x100] sm:$0xff]  ;;  %v200_v59 = vmul.f32 %v63_v53, %v63_v53 }
  0x30   :  { %v113_v6 = vadd.f32 %v112_v2, %v49_v61  ;;  %v248_v8 = vadd.f32 %v247_v4, %v185_v63  ;;  %v65_v61 = vld [vmem:[#allocation2 + $0x108] sm:$0xff]  ;;  %v201_v63 = vmul.f32 %v64_v57, %v64_v57 }
  0x32   :  { %v114_v10 = vadd.f32 %v113_v6, %v50_v1  ;;  %v249_v12 = vadd.f32 %v248_v8, %v186_v3  ;;  %v66_v1 = vld [vmem:[#allocation2 + $0x110] sm:$0xff]  ;;  %v202_v3 = vmul.f32 %v65_v61, %v65_v61 }
  0x34   :  { %v115_v14 = vadd.f32 %v114_v10, %v51_v5  ;;  %v250_v16 = vadd.f32 %v249_v12, %v187_v7  ;;  %v67_v5 = vld [vmem:[#allocation2 + $0x118] sm:$0xff]  ;;  %v203_v7 = vmul.f32 %v66_v1, %v66_v1 }
  0x36   :  { %v116_v18 = vadd.f32 %v115_v14, %v52_v9  ;;  %v251_v20 = vadd.f32 %v250_v16, %v188_v11  ;;  %v68_v9 = vld [vmem:[#allocation2 + $0x120] sm:$0xff]  ;;  %v204_v11 = vmul.f32 %v67_v5, %v67_v5 }
  0x38   :  { %v117_v22 = vadd.f32 %v116_v18, %v53_v13  ;;  %v252_v24 = vadd.f32 %v251_v20, %v189_v15  ;;  %v69_v13 = vld [vmem:[#allocation2 + $0x128] sm:$0xff]  ;;  %v205_v15 = vmul.f32 %v68_v9, %v68_v9 }
  0x3a   :  { %v118_v26 = vadd.f32 %v117_v22, %v54_v17  ;;  %v253_v28 = vadd.f32 %v252_v24, %v190_v19  ;;  %v70_v17 = vld [vmem:[#allocation2 + $0x130] sm:$0xff]  ;;  %v206_v19 = vmul.f32 %v69_v13, %v69_v13 }
  0x3c   :  { %v119_v30 = vadd.f32 %v118_v26, %v55_v21  ;;  %v254_v32 = vadd.f32 %v253_v28, %v191_v23  ;;  %v71_v21 = vld [vmem:[#allocation2 + $0x138] sm:$0xff]  ;;  %v207_v23 = vmul.f32 %v70_v17, %v70_v17 }
  0x3e   :  { %v120_v34 = vadd.f32 %v119_v30, %v56_v25  ;;  %v255_v36 = vadd.f32 %v254_v32, %v192_v27  ;;  %v72_v25 = vld [vmem:[#allocation2 + $0x140] sm:$0xff]  ;;  %v208_v27 = vmul.f32 %v71_v21, %v71_v21 }
  0x40   :  { %v121_v38 = vadd.f32 %v120_v34, %v57_v29  ;;  %v256_v40 = vadd.f32 %v255_v36, %v193_v31  ;;  %v73_v29 = vld [vmem:[#allocation2 + $0x148] sm:$0xff]  ;;  %v209_v31 = vmul.f32 %v72_v25, %v72_v25 }
  0x42   :  { %v122_v42 = vadd.f32 %v121_v38, %v58_v33  ;;  %v257_v44 = vadd.f32 %v256_v40, %v194_v35  ;;  %v74_v33 = vld [vmem:[#allocation2 + $0x150] sm:$0xff]  ;;  %v210_v35 = vmul.f32 %v73_v29, %v73_v29 }
  0x44   :  { %v123_v46 = vadd.f32 %v122_v42, %v59_v37  ;;  %v258_v48 = vadd.f32 %v257_v44, %v195_v39  ;;  %v75_v37 = vld [vmem:[#allocation2 + $0x158] sm:$0xff]  ;;  %v211_v39 = vmul.f32 %v74_v33, %v74_v33 }
  0x46   :  { %v124_v50 = vadd.f32 %v123_v46, %v60_v41  ;;  %v259_v52 = vadd.f32 %v258_v48, %v196_v43  ;;  %v76_v41 = vld [vmem:[#allocation2 + $0x160] sm:$0xff]  ;;  %v212_v43 = vmul.f32 %v75_v37, %v75_v37 }
  0x48   :  { %v125_v54 = vadd.f32 %v124_v50, %v61_v45  ;;  %v260_v56 = vadd.f32 %v259_v52, %v197_v47  ;;  %v77_v45 = vld [vmem:[#allocation2 + $0x168] sm:$0xff]  ;;  %v213_v47 = vmul.f32 %v76_v41, %v76_v41 }
  0x4a   :  { %v126_v58 = vadd.f32 %v125_v54, %v62_v49  ;;  %v261_v60 = vadd.f32 %v260_v56, %v198_v51  ;;  %v78_v49 = vld [vmem:[#allocation2 + $0x170] sm:$0xff]  ;;  %v214_v51 = vmul.f32 %v77_v45, %v77_v45 }
  0x4c   :  { %v127_v62 = vadd.f32 %v126_v58, %v63_v53  ;;  %v262_v0 = vadd.f32 %v261_v60, %v199_v55  ;;  %v79_v53 = vld [vmem:[#allocation2 + $0x178] sm:$0xff]  ;;  %v215_v55 = vmul.f32 %v78_v49, %v78_v49 }
  0x4e   :  { %v128_v2 = vadd.f32 %v127_v62, %v64_v57  ;;  %v263_v4 = vadd.f32 %v262_v0, %v200_v59  ;;  %v80_v57 = vld [vmem:[#allocation2 + $0x180] sm:$0xff]  ;;  %v216_v59 = vmul.f32 %v79_v53, %v79_v53 }
  0x50   :  { %v129_v6 = vadd.f32 %v128_v2, %v65_v61  ;;  %v264_v8 = vadd.f32 %v263_v4, %v201_v63  ;;  %v81_v61 = vld [vmem:[#allocation2 + $0x188] sm:$0xff]  ;;  %v217_v63 = vmul.f32 %v80_v57, %v80_v57 }
  0x52   :  { %v130_v10 = vadd.f32 %v129_v6, %v66_v1  ;;  %v265_v12 = vadd.f32 %v264_v8, %v202_v3  ;;  %v82_v1 = vld [vmem:[#allocation2 + $0x190] sm:$0xff]  ;;  %v218_v3 = vmul.f32 %v81_v61, %v81_v61 }
  0x54   :  { %v131_v14 = vadd.f32 %v130_v10, %v67_v5  ;;  %v266_v16 = vadd.f32 %v265_v12, %v203_v7  ;;  %v83_v5 = vld [vmem:[#allocation2 + $0x198] sm:$0xff]  ;;  %v219_v7 = vmul.f32 %v82_v1, %v82_v1 }
  0x56   :  { %v132_v18 = vadd.f32 %v131_v14, %v68_v9  ;;  %v267_v20 = vadd.f32 %v266_v16, %v204_v11  ;;  %v84_v9 = vld [vmem:[#allocation2 + $0x1a0] sm:$0xff]  ;;  %v220_v11 = vmul.f32 %v83_v5, %v83_v5 }
  0x58   :  { %v133_v22 = vadd.f32 %v132_v18, %v69_v13  ;;  %v268_v24 = vadd.f32 %v267_v20, %v205_v15  ;;  %v85_v13 = vld [vmem:[#allocation2 + $0x1a8] sm:$0xff]  ;;  %v221_v15 = vmul.f32 %v84_v9, %v84_v9 }
  0x5a   :  { %v134_v26 = vadd.f32 %v133_v22, %v70_v17  ;;  %v269_v28 = vadd.f32 %v268_v24, %v206_v19  ;;  %v86_v17 = vld [vmem:[#allocation2 + $0x1b0] sm:$0xff]  ;;  %v222_v19 = vmul.f32 %v85_v13, %v85_v13 }
  0x5c   :  { %v135_v30 = vadd.f32 %v134_v26, %v71_v21  ;;  %v270_v32 = vadd.f32 %v269_v28, %v207_v23  ;;  %v87_v21 = vld [vmem:[#allocation2 + $0x1b8] sm:$0xff]  ;;  %v223_v23 = vmul.f32 %v86_v17, %v86_v17 }
  0x5e   :  { %v136_v34 = vadd.f32 %v135_v30, %v72_v25  ;;  %v271_v36 = vadd.f32 %v270_v32, %v208_v27  ;;  %v88_v25 = vld [vmem:[#allocation2 + $0x1c0] sm:$0xff]  ;;  %v224_v27 = vmul.f32 %v87_v21, %v87_v21 }
  0x60   :  { %v137_v38 = vadd.f32 %v136_v34, %v73_v29  ;;  %v272_v40 = vadd.f32 %v271_v36, %v209_v31  ;;  %v89_v29 = vld [vmem:[#allocation2 + $0x1c8] sm:$0xff]  ;;  %v225_v31 = vmul.f32 %v88_v25, %v88_v25 }
  0x62   :  { %v138_v42 = vadd.f32 %v137_v38, %v74_v33  ;;  %v273_v44 = vadd.f32 %v272_v40, %v210_v35  ;;  %v90_v33 = vld [vmem:[#allocation2 + $0x1d0] sm:$0xff]  ;;  %v226_v35 = vmul.f32 %v89_v29, %v89_v29 }
  0x64   :  { %v139_v46 = vadd.f32 %v138_v42, %v75_v37  ;;  %v274_v48 = vadd.f32 %v273_v44, %v211_v39  ;;  %v91_v37 = vld [vmem:[#allocation2 + $0x1d8] sm:$0xff]  ;;  %v227_v39 = vmul.f32 %v90_v33, %v90_v33 }
  0x66   :  { %v140_v50 = vadd.f32 %v139_v46, %v76_v41  ;;  %v275_v52 = vadd.f32 %v274_v48, %v212_v43  ;;  %v92_v41 = vld [vmem:[#allocation2 + $0x1e0] sm:$0xff]  ;;  %v228_v43 = vmul.f32 %v91_v37, %v91_v37 }
  0x68   :  { %v141_v54 = vadd.f32 %v140_v50, %v77_v45  ;;  %v276_v56 = vadd.f32 %v275_v52, %v213_v47  ;;  %v93_v45 = vld [vmem:[#allocation2 + $0x1e8] sm:$0xff]  ;;  %v229_v47 = vmul.f32 %v92_v41, %v92_v41 }
  0x6a   :  { %v142_v58 = vadd.f32 %v141_v54, %v78_v49  ;;  %v277_v60 = vadd.f32 %v276_v56, %v214_v51  ;;  %v94_v49 = vld [vmem:[#allocation2 + $0x1f0] sm:$0xff]  ;;  %v230_v51 = vmul.f32 %v93_v45, %v93_v45 }
  0x6c   :  { %v143_v62 = vadd.f32 %v142_v58, %v79_v53  ;;  %v278_v0 = vadd.f32 %v277_v60, %v215_v55  ;;  %v95_v53 = vld [vmem:[#allocation2 + $0x1f8] sm:$0xff]  ;;  %v231_v55 = vmul.f32 %v94_v49, %v94_v49 }
  0x6d   :  { %v232_v58 = vmul.f32 %v95_v53, %v95_v53 }
  0x6e   :  { %v144_v2 = vadd.f32 %v143_v62, %v80_v57  ;;  %v279_v4 = vadd.f32 %v278_v0, %v216_v59 }
  0x70   :  { %v145_v6 = vadd.f32 %v144_v2, %v81_v61  ;;  %v280_v8 = vadd.f32 %v279_v4, %v217_v63 }
  0x72   :  { %v146_v10 = vadd.f32 %v145_v6, %v82_v1  ;;  %v281_v12 = vadd.f32 %v280_v8, %v218_v3 }
  0x74   :  { %v147_v14 = vadd.f32 %v146_v10, %v83_v5  ;;  %v282_v16 = vadd.f32 %v281_v12, %v219_v7  ;;  %v96_v7 = vld [vmem:[#allocation5] sm:$0x1]  ;;  %v168_v12 = vld [vmem:[#allocation6] sm:$0x1] }
  0x76   :  { %v148_v18 = vadd.f32 %v147_v14, %v84_v9  ;;  %v283_v20 = vadd.f32 %v282_v16, %v220_v11 }
  0x78   :  { %v149_v22 = vadd.f32 %v148_v18, %v85_v13  ;;  %v284_v24 = vadd.f32 %v283_v20, %v221_v15 }
  0x7a   :  { %v150_v26 = vadd.f32 %v149_v22, %v86_v17  ;;  %v285_v28 = vadd.f32 %v284_v24, %v222_v19 }
  0x7c   :  { %v151_v30 = vadd.f32 %v150_v26, %v87_v21  ;;  %v286_v32 = vadd.f32 %v285_v28, %v223_v23 }
  0x7e   :  { %v152_v34 = vadd.f32 %v151_v30, %v88_v25  ;;  %v287_v36 = vadd.f32 %v286_v32, %v224_v27 }
  0x80   :  { %v153_v38 = vadd.f32 %v152_v34, %v89_v29  ;;  %v288_v40 = vadd.f32 %v287_v36, %v225_v31 }
  0x82   :  { %v154_v42 = vadd.f32 %v153_v38, %v90_v33  ;;  %v289_v44 = vadd.f32 %v288_v40, %v226_v35 }
  0x84   :  { %v155_v46 = vadd.f32 %v154_v42, %v91_v37  ;;  %v290_v48 = vadd.f32 %v289_v44, %v227_v39 }
  0x86   :  { %v156_v50 = vadd.f32 %v155_v46, %v92_v41  ;;  %v291_v52 = vadd.f32 %v290_v48, %v228_v43 }
  0x88   :  { %v157_v54 = vadd.f32 %v156_v50, %v93_v45  ;;  %v292_v56 = vadd.f32 %v291_v52, %v229_v47 }
  0x8a   :  { %v158_v57 = vadd.f32 %v157_v54, %v94_v49  ;;  %v293_v59 = vadd.f32 %v292_v56, %v230_v51 }
  0x8c   :  { %v159_v60 = vadd.f32 %v158_v57, %v95_v53  ;;  %v294_v61 = vadd.f32 %v293_v59, %v231_v55 }
  0x8e   :  { %v160_v62 = vrot.slane %v159_v60, 4  ;;  %v295_v63 = vadd.f32 %v294_v61, %v232_v58 }
  0x90   :  { %v161_v0 = vadd.f32 %v160_v62, %v159_v60  ;;  %v296_v1 = vrot.slane %v295_v63, 4 }
  0x92   :  { %v162_v2 = vrot.slane %v161_v0, 2  ;;  %v297_v3 = vadd.f32 %v296_v1, %v295_v63 }
  0x94   :  { %v163_v4 = vadd.f32 %v162_v2, %v161_v0  ;;  %v298_v5 = vrot.slane %v297_v3, 2 }
  0x96   :  { %v164_v6 = vrot.slane %v163_v4, 1  ;;  %v299_v8 = vadd.f32 %v298_v5, %v297_v3 }
  0x98   :  { %v165_v9 = vadd.f32 %v164_v6, %v163_v4  ;;  %v300_v10 = vrot.slane %v299_v8, 1 }
  0x9a   :  { %v166_v11 = vadd.f32 %v165_v9, %v96_v7  ;;  %v301_v13 = vadd.f32 %v300_v10, %v299_v8 }
  0x9c   :  { %167 = vst [vmem:[#allocation5] sm:$0x1] %v166_v11  ;;  %v302_v14 = vadd.f32 %v301_v13, %v168_v12 }
  0x9d   :  { %370 = shalt.err (!%p367_p9)
}
  0x9e   :  { %313 = dma.vmem_to_hbm [thread:$0]  %s311_s16, 16, %s436_s1, [#allocation4]   ;;  %303 = vst [vmem:[#allocation6] sm:$0x1] %v302_v14 }
  0x9f   :  { %s379_s23 = scalar_lea.vmem %s321_s18, 16  ;;  %s383_s24 = scalar_lea.vmem %s321_s18, 32 }
  0xa0   :  { %p380_p10 = scmp.ne.s32.totalorder %s321_s18, %s379_s23  ;;  %p384_p11 = scmp.lt.s32.totalorder %s321_s18, %s321_s18 }
  0xa1   :  { %p385_p12 = scmp.lt.s32.totalorder %s383_s24, %s379_s23 }
  0xa3   :  { %p386_p13 = por %p385_p12, %p384_p11 }
  0xa5   :  { %p387_p0 = pnand %p386_p13, %p380_p10 }
  0xa7   :  { %390 = shalt.err (!%p387_p0)
}
  0xa8   :  { %323 = dma.vmem_to_hbm [thread:$0]  %s321_s18, 16, %s437_s2, [#allocation7]  }
  0xa9   :  { %401 = dma.done.wait [#allocation4], 16  }
  0xaa   :  { %402 = vsyncadd [#allocation4], 4294967280 }
  0xab   :  { %403 = dma.done.wait [#allocation7], 16  }
  0xac   :  { %404 = vsyncadd [#allocation7], 4294967280 }
  0xad   :  { %330 = vsyncpa [#allocation3], 1 }
  0xae   :  { %331 = vsyncpa [#allocation4], 1 }
  0xaf   :  { %332 = vsyncpa [#allocation7], 1 }

</bundles_post_ra>
